<compile_context>
chip_gen: v6e
topology: v6e:2x2x1
jax: 0.10.0
libtpu: 0.0.40
codegen_flags: <defaults>
</compile_context>

<pallas_src>
import math
import functools

import numpy as np
import jax
import jax.numpy as jnp
from jax.experimental import pallas as pl
from jax.experimental.pallas import tpu as pltpu


def _fourier_kernel(idx_ref, const_ref, out_ref, *, k_groups: int):
    # idx_ref  : (TR, k)     int32   -- k packed indices per lane-dense output row
    # const_ref: (k+1, W)    float32 -- rows 0..k-1: div masked to lane-group i,
    #                                   row k: phase + 2*min_index*div (folded bias)
    # out_ref  : (TR, W)     float32 -- lane-dense packed output, W = k*emb_dim
    pos = idx_ref[...].astype(jnp.float32)                                # (TR, k)
    # arg[r, L] = idx[r, L // E] * div[(L % E) // 2] + (phase[L % E] + 2*min_index*div)
    arg = pos[:, 0:1] * const_ref[0:1, :] + const_ref[k_groups:k_groups + 1, :]
    for i in range(1, k_groups):                                          # static unroll
        arg = arg + pos[:, i:i + 1] * const_ref[i:i + 1, :]
    # TODO(synk): MXU-offload of the expansion above once bundle-verified VPU-bound.
    out_ref[...] = jnp.sin(arg)        # single transcendental; cos = sin(x + pi/2)


def _build_const(emb_dim: int, min_index: int, max_index: int, k: int) -> jax.Array:
    """(k+1, k*emb_dim) constant: k group-masked div rows + 1 phase/bias row."""
    max_len = max_index - min_index
    half = np.arange(0, emb_dim, 2, dtype=np.float32)
    div_term = np.exp(half * (-math.log(float(max_len)) / emb_dim))       # (E/2,)
    div_full = np.repeat(div_term, 2).astype(np.float32)                  # (E,)  div[l//2]
    phase = np.where(np.arange(emb_dim) % 2 == 0, 0.0, math.pi / 2).astype(np.float32)
    W = k * emb_dim
    div_tiled = np.tile(div_full, k)                                      # (W,)
    # Fold the module's `pe[idx + min_index]` offset (angle (idx + 2*min_index)*div)
    # into the bias row: no per-index integer add in the kernel.
    bias_tiled = (np.tile(phase, k) + 2.0 * float(min_index) * div_tiled).astype(np.float32)
    group = np.arange(W) // emb_dim
    rows = [np.where(group == i, div_tiled, 0.0).astype(np.float32) for i in range(k)]
    return jnp.asarray(np.stack(rows + [bias_tiled]))                     # (k+1, W)


def integer_fourier_embedding(idx, emb_dim: int, min_index: int = 0,
                              max_index: int = 1000, *, row_tile: int = 8192):
    """Pallas implementation of IntegerFourierEmbedding.forward (jit-friendly)."""
    assert emb_dim % 2 == 0, "emb_dim must be even (same assumption as the PyTorch module)"
    idx = jnp.asarray(idx)
    orig_shape = idx.shape
    idx_flat = idx.reshape(-1).astype(jnp.int32)
    n = idx_flat.shape[0]

    # Lane-dense pack factor: smallest k with k*emb_dim a multiple of 128 (capped).
    g = math.gcd(emb_dim, 128)
    k = 128 // g
    if k * emb_dim > 2048:           # pathological emb_dim: fall back to unpacked rows
        k = 1
    W = k * emb_dim

    # k-alignment pad of the index vector (only when n % k != 0).
    n_pad = ((n + k - 1) // k) * k
    if n_pad != n:
        idx_flat = jnp.pad(idx_flat, (0, n_pad - n), constant_values=min_index)
    rows_total = n_pad // k
    idx2d = idx_flat.reshape(rows_total, k)

    # --- row-tile selection ---------------------------------------------------
    # Per-step VMEM (double-buffered): out block (tr, W) f32  +  idx block (tr, k)
    # int32 lane-padded to (tr, 128).  Budget ~16 MiB total -> tr = 8192 when W=128.
    vmem_budget = 16 * 1024 * 1024
    bytes_per_row = (W + 128) * 4 * 2
    tr_cap = max(8, (vmem_budget // bytes_per_row) // 8 * 8)
    if rows_total <= 8:
        tr = rows_total                                   # single full-extent block
    else:
        tr = min(row_tile, tr_cap, rows_total)
        tr = max(8, (tr // 8) * 8)                        # (8,128) block rule
        if tr >= rows_total and rows_total >= 16:         # keep >=2 steps for v7x's 2 TCs
            tr = max(8, (rows_total // 2 // 8) * 8)

    const = _build_const(emb_dim, min_index, max_index, k)
    kernel = functools.partial(_fourier_kernel, k_groups=k)

    out = pl.pallas_call(
        kernel,
        out_shape=jax.ShapeDtypeStruct((rows_total, W), jnp.float32),
        grid_spec=pltpu.PrefetchScalarGridSpec(
            num_scalar_prefetch=0,
            grid=(pl.cdiv(rows_total, tr),),              # ragged tail -> masked writeback
            in_specs=[
                pl.BlockSpec((tr, k), lambda i: (i, 0)),
                pl.BlockSpec((k + 1, W), lambda i: (0, 0)),   # resident constant
            ],
            out_specs=pl.BlockSpec((tr, W), lambda i: (i, 0)),
        ),
        compiler_params=pltpu.CompilerParams(
            dimension_semantics=("parallel",),
            vmem_limit_bytes=32 * 1024 * 1024,            # safe on v5e's 16 MiB default
        ),
    )(idx2d, const)

    # Free layout plumbing: (rows, k*E) and (n_pad, E) are the same memory.
    out = out.reshape(n_pad, emb_dim)
    if n_pad != n:
        out = out[:n]
    return out.reshape(*orig_shape, emb_dim)


def _reference(idx, emb_dim, min_index=0, max_index=1000):
    """Pure-JAX replica of the PyTorch module (table build + row gather)."""
    max_len = max_index - min_index
    position = jnp.arange(min_index, max_index + 1, dtype=jnp.float32)[:, None]
    div_term = jnp.exp(
        jnp.arange(0, emb_dim, 2, dtype=jnp.float32)
        * (-math.log(float(max_len)) / emb_dim))
    pe = jnp.zeros((max_len + 1, emb_dim), jnp.float32)
    pe = pe.at[:, 0::2].set(jnp.sin(position * div_term))
    pe = pe.at[:, 1::2].set(jnp.cos(position * div_term))
    idx_flat = idx.reshape(-1)
    out = pe[idx_flat + min_index]
    return out.reshape(*idx.shape, emb_dim)


if __name__ == "__main__":
    key = jax.random.PRNGKey(0)
    k1, k2 = jax.random.split(key)

    # --- test 1: module defaults-style call, even grid split (2 steps) -------
    emb_dim = 32
    min_index, max_index = 0, 100
    idx = jax.random.randint(k1, (2, 4, 16), minval=min_index,
                             maxval=max_index, dtype=jnp.int32)
    out = jax.block_until_ready(integer_fourier_embedding(idx, emb_dim, min_index, max_index))
    ref = _reference(idx, emb_dim, min_index, max_index)
    assert out.shape == (2, 4, 16, emb_dim) and out.dtype == jnp.float32
    assert bool(jnp.allclose(out, ref, atol=1e-4, rtol=1e-4)), "mismatch vs reference (test 1)"

    # --- test 2: min_index != 0, k-alignment pad and ragged-tail grid step ----
    min_index2, max_index2 = 5, 200
    # keep idx + min_index within the PyTorch table (rows 0..max_len), i.e. idx < max - 2*min
    idx2 = jax.random.randint(k2, (5, 13), minval=min_index2,
                              maxval=max_index2 - 2 * min_index2, dtype=jnp.int32)
    out2 = jax.block_until_ready(
        integer_fourier_embedding(idx2, emb_dim, min_index2, max_index2))
    ref2 = _reference(idx2, emb_dim, min_index2, max_index2)
    assert out2.shape == (5, 13, emb_dim)
    assert bool(jnp.allclose(out2, ref2, atol=1e-4, rtol=1e-4)), "mismatch vs reference (test 2)"

    print("KERNEL_OK")
</pallas_src>

<mosaic_0001>
module attributes {stable_mosaic.version = 11 : i64} {
  func.func @_fourier_kernel(%arg0: i32, %arg1: memref<16x4xi32, #tpu.memory_space<vmem>>, %arg2: memref<5x128xf32, #tpu.memory_space<vmem>>, %arg3: memref<16x128xf32, #tpu.memory_space<vmem>>) attributes {dimension_semantics = [#tpu.dimension_semantics<parallel>], iteration_bounds = array<i64: 2>, scalar_prefetch = 0 : i64, scratch_operands = 0 : i64, tpu.core_type = #tpu.core_type<tc>, window_params = [{transform_indices = @transform_0, window_bounds = array<i64: 16, 4>}, {pipeline_mode = #tpu.pipeline_mode<synchronous>, transform_indices = @transform_1, window_bounds = array<i64: 5, 128>}, {transform_indices = @transform_2, window_bounds = array<i64: 16, 128>}]} {
    %c0 = arith.constant 0 : index
    %c0_0 = arith.constant 0 : index
    %0 = vector.load %arg1[%c0, %c0_0] : memref<16x4xi32, #tpu.memory_space<vmem>>, vector<16x4xi32>
    %1 = arith.sitofp %0 : vector<16x4xi32> to vector<16x4xf32>
    %2 = vector.extract_strided_slice %1 {offsets = [0, 0], sizes = [16, 1], strides = [1, 1]} : vector<16x4xf32> to vector<16x1xf32>
    %c0_1 = arith.constant 0 : index
    %c0_2 = arith.constant 0 : index
    %3 = vector.load %arg2[%c0_1, %c0_2] : memref<5x128xf32, #tpu.memory_space<vmem>>, vector<1x128xf32>
    %4 = vector.broadcast %2 : vector<16x1xf32> to vector<16x128xf32>
    %5 = vector.broadcast %3 : vector<1x128xf32> to vector<16x128xf32>
    %6 = arith.mulf %4, %5 : vector<16x128xf32>
    %c4 = arith.constant 4 : index
    %c0_3 = arith.constant 0 : index
    %7 = vector.load %arg2[%c4, %c0_3] : memref<5x128xf32, #tpu.memory_space<vmem>>, vector<1x128xf32>
    %8 = vector.broadcast %7 : vector<1x128xf32> to vector<16x128xf32>
    %9 = arith.addf %6, %8 : vector<16x128xf32>
    %10 = vector.extract_strided_slice %1 {offsets = [0, 1], sizes = [16, 1], strides = [1, 1]} : vector<16x4xf32> to vector<16x1xf32>
    %c1 = arith.constant 1 : index
    %c0_4 = arith.constant 0 : index
    %11 = vector.load %arg2[%c1, %c0_4] : memref<5x128xf32, #tpu.memory_space<vmem>>, vector<1x128xf32>
    %12 = vector.broadcast %10 : vector<16x1xf32> to vector<16x128xf32>
    %13 = vector.broadcast %11 : vector<1x128xf32> to vector<16x128xf32>
    %14 = arith.mulf %12, %13 : vector<16x128xf32>
    %15 = arith.addf %9, %14 : vector<16x128xf32>
    %16 = vector.extract_strided_slice %1 {offsets = [0, 2], sizes = [16, 1], strides = [1, 1]} : vector<16x4xf32> to vector<16x1xf32>
    %c2 = arith.constant 2 : index
    %c0_5 = arith.constant 0 : index
    %17 = vector.load %arg2[%c2, %c0_5] : memref<5x128xf32, #tpu.memory_space<vmem>>, vector<1x128xf32>
    %18 = vector.broadcast %16 : vector<16x1xf32> to vector<16x128xf32>
    %19 = vector.broadcast %17 : vector<1x128xf32> to vector<16x128xf32>
    %20 = arith.mulf %18, %19 : vector<16x128xf32>
    %21 = arith.addf %15, %20 : vector<16x128xf32>
    %22 = vector.extract_strided_slice %1 {offsets = [0, 3], sizes = [16, 1], strides = [1, 1]} : vector<16x4xf32> to vector<16x1xf32>
    %c3 = arith.constant 3 : index
    %c0_6 = arith.constant 0 : index
    %23 = vector.load %arg2[%c3, %c0_6] : memref<5x128xf32, #tpu.memory_space<vmem>>, vector<1x128xf32>
    %24 = vector.broadcast %22 : vector<16x1xf32> to vector<16x128xf32>
    %25 = vector.broadcast %23 : vector<1x128xf32> to vector<16x128xf32>
    %26 = arith.mulf %24, %25 : vector<16x128xf32>
    %27 = arith.addf %21, %26 : vector<16x128xf32>
    %28 = math.sin %27 : vector<16x128xf32>
    %c0_7 = arith.constant 0 : index
    %c0_8 = arith.constant 0 : index
    %29 = vector.load %arg3[%c0_7, %c0_8] : memref<16x128xf32, #tpu.memory_space<vmem>>, vector<16x128xf32>
    tpu.vector_store %arg3[%c0_7, %c0_8], %28 {strides = array<i32>} : memref<16x128xf32, #tpu.memory_space<vmem>>, vector<16x128xf32>,
    return
  }
  func.func @transform_0(%arg0: i32) -> (i32, i32) {
    %c0_i32 = arith.constant 0 : i32
    %c0_i32_0 = arith.constant 0 : i32
    return %arg0, %c0_i32 : i32, i32
  }
  func.func @transform_1(%arg0: i32) -> (i32, i32) {
    %c0_i32 = arith.constant 0 : i32
    %c0_i32_0 = arith.constant 0 : i32
    %c0_i32_1 = arith.constant 0 : i32
    return %c0_i32, %c0_i32_0 : i32, i32
  }
  func.func @transform_2(%arg0: i32) -> (i32, i32) {
    %c0_i32 = arith.constant 0 : i32
    %c0_i32_0 = arith.constant 0 : i32
    return %arg0, %c0_i32 : i32, i32
  }
}

</mosaic_0001>

<bundles_post_ra>
// kernel: tpu_custom_call.1
= control target key start
LH: loop header
LB: loop body
LE: loop exit
PB: predicated region body
PF: predicated region fallthrough
CT: control target
= control target key end

     0   :  { %7 = vsyncpa [#allocation3], 0  ;;  %s881_s0 = inlined_call_operand.vmem [shape: s32[32,4], index: 0, kind: input, shape index: {}]   ;;  %s882_s1 = inlined_call_operand.vmem [shape: f32[5,128], index: 1, kind: input, shape index: {}]   ;;  %s883_s2 = inlined_call_operand.hbm [shape: f32[32,128], index: 2, kind: output, shape index: {}]  }
   0x1   :  { %9 = vsyncpa [#allocation3 + $0x1], 0  ;;  %s699_s9 = smov 0   ;;  %s701_s10 = smov 0  }
   0x2   :  { %s703_s11 = smov 0   ;;  %s705_s12 = smov 0  }
   0x3 LB: > { %s720_s13 = sadd.s32 4294967295, %s669_s12   ;;  %s510_s14 = sadd.s32 4294967294, %s669_s12   ;;  %s669_s12 = sphi %s705_s12, %s889_s12   ;;  %s665_s11 = sphi %s703_s11, %s888_s11   ;;  %s661_s10 = sphi %s701_s10, %s887_s10   ;;  %s657_s9 = sphi %s699_s9, %s886_s9  }
   0x4   : > { %s724_s15 = sadd.s32 1, %s669_s12   ;;  %s69_s16 = sadd.s32 1, %s665_s11 }
   0x5   : > { %s66_s17 = ssub.s32 %s669_s12, %s724_s15  ;;  %p79_p0 = scmp.ne.s32.totalorder %s665_s11, %s661_s10 }
   0x6   : > { %p67_p1 = scmp.eq.s32.totalorder %s66_s17, 0  ;;  %p80_p2 = scmp.eq.s32.totalorder %s720_s13, 1 }
   0x7   : > { %p85_p3 = scmp.ne.s32.totalorder %s661_s10, %s657_s9  ;;  %p86_p4 = scmp.eq.s32.totalorder %s510_s14, 1 }
   0x8   : > { %s735_s18 = scalar_select %p67_p1, %s665_s11, %s69_s16  }
   0x9   : > { %p737_p5 = por %p80_p2, %p79_p0  ;;  %p741_p6 = por %p86_p4, %p85_p3 }
   0xa   : > { %p513_p7 = scmp.ge.s32.totalorder %s669_s12, 1  ;;  %p116_p8 = scmp.lt.s32.totalorder %s669_s12, 3 }
   0xc   : > { %p117_p9 = pnand %p513_p7, %p116_p8 }
   0xd   : > { %s515_s21 = sshll.u32 (!%p117_p9), %s720_s13, 1  ;;  %s135_s8 = sand.u32 (!%p117_p9), 1, %s661_s10  }
   0xe   : > { %120 = sbr.rel (%p117_p9) target bundleno = 273 (0x111), region = 28  ;;  %p139_p10 = scmp.lt.s32.totalorder (!%p117_p9), %s515_s21, 3 }
   0xf   : > { %s514_s14 = sshll.u32 (!%p117_p9), %s135_s8, 4  ;;  %s535_s17 = sshll.u32 (!%p117_p9), %s720_s13, 8 }
  0x10   : > { %s137_s16 = scalar_lea.vmem (!%p117_p9), [#allocation2], %s514_s14  ;;  %s834_s24 = scalar_lea.hbm (!%p117_p9), %s883_s2, %s535_s17 }
  0x11   : > { %s841_s13 = scalar_lea.sflag (!%p117_p9), [#allocation3], %s135_s8  ;;  %s681_s26 = smov (!%p117_p9), [#allocation2]  }
  0x12   : > { %s613_s27 = sshll.u32 (!%p117_p9), %s681_s26, 4  ;;  %s614_s27 = int_to_ptr.vmem [resolvable:$false] %s613_s27 }
  0x13   : > { %v671_v0 = vmov 1   ;;  %v672_v1 = vmov 0   ;;  %s891_s21 = smov (!%p139_p10, %s515_s21), 3  ;;  %v673_v6 = vmov 2   ;;  %v674_v7 = vmov 3   ;;  %s615_s28 = scalar_lea.vmem %s614_s27, 512 }
  0x14   : > { %596 = vset.pattern.permute.xlu1 %v671_v0  ;;  %595 = vset.pattern.permute.xlu0 %v672_v1  ;;  %s516_s22 = sshll.u32 %s891_s21, 3  ;;  %v517_v10 = vld [vmem:[%s882_s1] ss:$0 sm:$0xff]  ;;  %v518_v15 = vld [vmem:[%s882_s1 + $0x4] ss:$0 sm:$0xff]  ;;  %s448_s21 = sshll.u32 %s137_s16, 4  ;;  %s836_s21 = int_to_ptr.vmem [resolvable:$true] %s448_s21 }
  0x15   : > { %s142_s25 = scalar_lea.vmem %s881_s0, %s516_s22  ;;  %v519_v17 = vld [vmem:[%s882_s1 + $0x1] ss:$0 sm:$0xff]  ;;  %v520_v18 = vld [vmem:[%s882_s1 + $0x2] ss:$0 sm:$0xff]  ;;  %v521_v27 = vld [vmem:[%s882_s1 + $0x3] ss:$0 sm:$0xff]  ;;  %p616_p0 = scmp.lt.s32.totalorder %s836_s21, %s614_s27 }
  0x16   : > { %v145_v2 = vld [vmem:[%s142_s25] sm:$0xff]  ;;  %v146_v3 = vld [vmem:[%s142_s25 + $0x8] sm:$0xff]  ;;  %v675_v57 = vmov 683565275   ;;  %v676_v61 = vmov 2475754826  }
  0x17   : > { %v147_v4 = vcvt.s32.f32 %v145_v2  ;;  %v148_v5 = vcvt.s32.f32 %v146_v3  ;;  %v677_v63 = vmov 2131351028   ;;  %v678_v1 = vmov 2102212464   ;;  %s609_s25 = scalar_lea.vmem %s836_s21, 256 }
  0x18   : > { %v679_v3 = vmov 920167782   ;;  %p610_p11 = scmp.ne.s32.totalorder %s836_s21, %s609_s25  ;;  %p617_p1 = scmp.lt.s32.totalorder %s615_s28, %s609_s25 }
  0x19   : > { %175 = vperm.xlu1 %596, %v147_v4   ;;  %152 = vperm.xlu0 %595, %v147_v4  }
  0x1a   : > { %p611_p12 = pnand %p610_p11, %p737_p5  ;;  %p618_p2 = por %p617_p1, %p616_p0 }
  0x1c   : > { %p612_p13 = pneg %p611_p12 }
  0x1d   : > { %179 = vperm.xlu1 %596, %v148_v5   ;;  %157 = vperm.xlu0 %595, %v148_v5  }
  0x1e   : > { %p619_p3 = pnand %p618_p2, %p612_p13 }
  0x21   : > { %598 = vset.pattern.permute.xlu1 %v673_v6  ;;  %597 = vset.pattern.permute.xlu0 %v673_v6 }
  0x22   : > { %196 = vperm.xlu1 %598, %v148_v5   ;;  %192 = vperm.xlu0 %597, %v147_v4  }
  0x26   : > { %599 = vset.pattern.permute.xlu1 %v674_v7  ;;  %600 = vset.pattern.permute.xlu0 %v674_v7 }
  0x27   : > { %209 = vperm.xlu1 %599, %v147_v4   ;;  %213 = vperm.xlu0 %600, %v148_v5  }
  0x94   : > { %v176_v8 = vpop.permute.xlu1 %175  ;;  %v153_v9 = vpop.permute.xlu0 %152 }
  0x95   : > { %v164_v13 = vmul.f32 %v517_v10, %v153_v9  ;;  %v186_v23 = vmul.f32 %v519_v17, %v176_v8 }
  0x97   : > { %v171_v19 = vadd.f32 %v518_v15, %v164_v13 }
  0x98   : > { %v180_v11 = vpop.permute.xlu1 %179  ;;  %v158_v12 = vpop.permute.xlu0 %157 }
  0x99   : > { %v165_v14 = vmul.f32 %v517_v10, %v158_v12  ;;  %v187_v20 = vmul.f32 %v519_v17, %v180_v11  ;;  %v188_v28 = vadd.f32 %v186_v23, %v171_v19  ;;  %v680_v10 = vmov 1326507024  }
  0x9b   : > { %v172_v16 = vadd.f32 %v518_v15, %v165_v14 }
  0x9d   : > { %v197_v21 = vpop.permute.xlu1 %196  ;;  %v193_v22 = vpop.permute.xlu0 %192  ;;  %v189_v24 = vadd.f32 %v187_v20, %v172_v16 }
  0x9e   : > { %v204_v25 = vmul.f32 %v520_v18, %v197_v21  ;;  %v203_v26 = vmul.f32 %v520_v18, %v193_v22 }
  0xa0   : > { %v206_v31 = vadd.f32 %v204_v25, %v189_v24  ;;  %v205_v32 = vadd.f32 %v203_v26, %v188_v28 }
  0xa2   : > { %v210_v29 = vpop.permute.xlu1 %209  ;;  %v214_v30 = vpop.permute.xlu0 %213 }
  0xa3   : > { %v220_v33 = vmul.f32 %v521_v27, %v210_v29  ;;  %v221_v34 = vmul.f32 %v521_v27, %v214_v30 }
  0xa5   : > { %v766_v35 = vadd.f32 %v220_v33, %v205_v32  ;;  %v768_v36 = vadd.f32 %v221_v34, %v206_v31 }
  0xa7   : > { %v224_v37 = vand.u32 2147483647, %v766_v35  ;;  %v227_v38 = vand.u32 2139095040, %v766_v35  ;;  %v331_v39 = vand.u32 2139095040, %v768_v36  ;;  %v328_v42 = vand.u32 2147483647, %v768_v36 }
  0xa8   : > { %vm226_vm14 = vcmp.lt.s32.totalorder %v766_v35, 0 }
  0xa9   : > { %v228_v40 = vshrl.u32 %v227_v38, 23  ;;  %v231_v41 = vand.u32 8388607, %v224_v37  ;;  %v332_v43 = vshrl.u32 %v331_v39, 23  ;;  %v778_v48 = vand.u32 8388607, %v328_v42 }
  0xaa   : > { %vm225_vm15 = vcmp.le.f32.partialorder %v224_v37, 0.7853982 }
  0xab   : > { %v522_v44 = vadd.s32 4294967169, %v228_v40  ;;  %v526_v45 = vadd.s32 4294967169, %v332_v43  ;;  %v232_v47 = vor.u32 8388608, %v231_v41  ;;  %v336_v55 = vor.u32 8388608, %v778_v48 }
  0xad   : > { %v234_v46 = vadd.s32 1, %v522_v44  ;;  %v338_v49 = vadd.s32 1, %v526_v45  ;;  %v780_v54 = vshll.u32 %v232_v47, 8 }
  0xaf   : > { %vm235_vm0 = vcmp.gt.s32.totalorder %v234_v46, 0  ;;  %vm339_vm1 = vcmp.gt.s32.totalorder %v338_v49, 0 }
  0xb0   : > { %v236_v50 = vsel %vm235_vm0, %v234_v46, 0  ;;  %v340_v53 = vsel %vm339_vm1, %v338_v49, 0  ;;  %v376_v49 = vshll.u32 %v336_v55, 8  ;;  %vm330_vm0 = vcmp.lt.s32.totalorder %v768_v36, 0 }
  0xb1   : > { %v237_v51 = vshrl.u32 %v236_v50, 5  ;;  %v238_v52 = vand.u32 31, %v236_v50  ;;  %v783_v59 = vshrl.u32 %v340_v53, 5  ;;  %v342_v60 = vand.u32 31, %v340_v53 }
  0xb2   : > { %vm329_vm1 = vcmp.le.f32.partialorder %v328_v42, 0.7853982 }
  0xb3   : > { %v239_v56 = vsub.s32 32, %v238_v52  ;;  %v241_v58 = vshll.u32 %v675_v57, %v238_v52  ;;  %v244_v62 = vshll.u32 %v676_v61, %v238_v52  ;;  %v247_v0 = vshll.u32 %v677_v63, %v238_v52 }
  0xb4   : > { %v250_v2 = vshll.u32 %v678_v1, %v238_v52  ;;  %v253_v4 = vshll.u32 %v679_v3, %v238_v52  ;;  %vm256_vm2 = vcmp.lt.s32.totalorder %v237_v51, 1  ;;  %vm257_vm3 = vcmp.lt.s32.totalorder %v237_v51, 2 }
  0xb5   : > { %v242_v5 = vshrl.u32 %v676_v61, %v239_v56  ;;  %v245_v6 = vshrl.u32 %v677_v63, %v239_v56  ;;  %v248_v7 = vshrl.u32 %v678_v1, %v239_v56  ;;  %v240_v8 = vshrl.u32 %v675_v57, %v239_v56 }
  0xb6   : > { %v251_v9 = vshrl.u32 %v679_v3, %v239_v56  ;;  %v254_v11 = vshrl.u32 %v680_v10, %v239_v56  ;;  %v343_v15 = vsub.s32 32, %v342_v60  ;;  %vm258_vm4 = vcmp.lt.s32.totalorder %v237_v51, 3 }
  0xb7   : > { %v243_v12 = vor.u32 %v242_v5, %v241_v58  ;;  %v246_v13 = vor.u32 %v245_v6, %v244_v62  ;;  %v249_v14 = vor.u32 %v248_v7, %v247_v0  ;;  %vm259_vm5 = vcmp.lt.s32.totalorder %v237_v51, 4 }
  0xb8   : > { %v252_v16 = vor.u32 %v251_v9, %v250_v2  ;;  %v255_v17 = vor.u32 %v254_v11, %v253_v4  ;;  %v345_v25 = vshll.u32 %v675_v57, %v342_v60  ;;  %v346_v28 = vshrl.u32 %v676_v61, %v343_v15 }
  0xb9   : > { %v260_v18 = vsel %vm256_vm2, %v240_v8, %v243_v12  ;;  %v261_v19 = vsel %vm259_vm5, %v249_v14, 2102212464  ;;  %v264_v20 = vsel %vm256_vm2, %v243_v12, %v246_v13  ;;  %v268_v21 = vsel %vm256_vm2, %v246_v13, %v249_v14 }
  0xba   : > { %v262_v22 = vsel %vm258_vm4, %v246_v13, %v261_v19  ;;  %v265_v23 = vsel %vm259_vm5, %v252_v16, 920167782  ;;  %v269_v24 = vsel %vm259_vm5, %v255_v17, 1326507024  ;;  %v348_v29 = vshll.u32 %v676_v61, %v342_v60 }
  0xbb   : > { %v266_v26 = vsel %vm258_vm4, %v249_v14, %v265_v23  ;;  %v270_v27 = vsel %vm258_vm4, %v252_v16, %v269_v24  ;;  %v263_v30 = vsel %vm257_vm3, %v260_v18, %v262_v22  ;;  %v349_v33 = vshrl.u32 %v677_v63, %v343_v15 }
  0xbc   : > { %v267_v31 = vsel %vm257_vm3, %v264_v20, %v266_v26  ;;  %v271_v32 = vsel %vm257_vm3, %v268_v21, %v270_v27  ;;  %v347_v41 = vor.u32 %v346_v28, %v345_v25  ;;  %v351_v44 = vshll.u32 %v677_v63, %v342_v60 }
  0xbd   : > { %v792_v34 = vmul.u32.u64.low %v780_v54, %v271_v32  ;;  %v793_v38 = vmul.u32.u64.high %v780_v54, %v271_v32, %v792_v34  ;;  %v796_v39 = vmul.u32.u64.low %v780_v54, %v267_v31  ;;  %v797_v40 = vmul.u32.u64.high %v780_v54, %v267_v31, %v796_v39 }
  0xbe   : > { %v350_v43 = vor.u32 %v349_v33, %v348_v29  ;;  %v352_v45 = vshrl.u32 %v678_v1, %v343_v15  ;;  %v354_v46 = vshll.u32 %v678_v1, %v342_v60  ;;  %v355_v47 = vshrl.u32 %v679_v3, %v343_v15 }
  0xbf   : > { %v358_v48 = vshrl.u32 %v680_v10, %v343_v15  ;;  %v279_v50 = vmul.u32 %v780_v54, %v263_v30  ;;  %v344_v51 = vshrl.u32 %v675_v57, %v343_v15  ;;  %v357_v53 = vshll.u32 %v679_v3, %v342_v60 }
  0xc0   : > { %v353_v52 = vor.u32 %v352_v45, %v351_v44  ;;  %vm281_vm6 = vc.u32 %v793_v38, %v796_v39  ;;  %v282_v56 = vadd.s32 1, %v797_v40  ;;  %v356_v58 = vor.u32 %v355_v47, %v354_v46 }
  0xc1   : > { %vm360_vm7 = vcmp.lt.s32.totalorder %v783_v59, 1  ;;  %v359_v61 = vor.u32 %v358_v48, %v357_v53  ;;  %vm362_vm8 = vcmp.lt.s32.totalorder %v783_v59, 3  ;;  %vm363_vm9 = vcmp.lt.s32.totalorder %v783_v59, 4 }
  0xc2   : > { %v368_v62 = vsel %vm360_vm7, %v347_v41, %v350_v43  ;;  %v283_v55 = vsel %vm281_vm6, %v282_v56, %v797_v40  ;;  %v365_v63 = vsel %vm363_vm9, %v353_v52, 2102212464  ;;  %v369_v54 = vsel %vm363_vm9, %v356_v58, 920167782 }
  0xc3   : > { %v372_v57 = vsel %vm360_vm7, %v350_v43, %v353_v52  ;;  %v284_v0 = vadd.s32 %v283_v55, %v279_v50  ;;  %vm361_vm10 = vcmp.lt.s32.totalorder %v783_v59, 2  ;;  %v370_v60 = vsel %vm362_vm8, %v353_v52, %v369_v54 }
  0xc4   : > { %v373_v1 = vsel %vm363_vm9, %v359_v61, 1326507024  ;;  %v364_v2 = vsel %vm360_vm7, %v344_v51, %v347_v41  ;;  %v366_v3 = vsel %vm362_vm8, %v350_v43, %v365_v63  ;;  %v371_v4 = vsel %vm361_vm10, %v368_v62, %v370_v60 }
  0xc5   : > { %v374_v5 = vsel %vm362_vm8, %v356_v58, %v373_v1  ;;  %v285_v6 = vadd.s32 536870912, %v284_v0  ;;  %v807_v8 = vmul.u32.u64.low %v376_v49, %v371_v4  ;;  %v808_v9 = vmul.u32.u64.high %v376_v49, %v371_v4, %v807_v8 }
  0xc6   : > { %v375_v7 = vsel %vm361_vm10, %v372_v57, %v374_v5  ;;  %v367_v13 = vsel %vm361_vm10, %v364_v2, %v366_v3  ;;  %v280_v29 = vadd.s32 %v796_v39, %v793_v38  ;;  %vm316_vm5 = vweird.f32 %v766_v35 }
  0xc7   : > { %v810_v10 = vmul.u32.u64.low %v376_v49, %v375_v7  ;;  %v811_v11 = vmul.u32.u64.high %v376_v49, %v375_v7, %v810_v10  ;;  %v286_v12 = vshrl.u32 %v285_v6, 30  ;;  %v386_v15 = vadd.s32 1, %v808_v9 }
  0xc8   : > { %v383_v59 = vmul.u32 %v376_v49, %v367_v13  ;;  %vm420_vm9 = vweird.f32 %v768_v36 }
  0xc9   : > { %v287_v14 = vshll.u32 %v286_v12, 30  ;;  %vm385_vm11 = vc.u32 %v811_v11, %v807_v8  ;;  %v384_v50 = vadd.s32 %v807_v8, %v811_v11  ;;  %v310_v61 = vsub.s32 4, %v286_v12 }
  0xca   : > { %v387_v17 = vsel %vm385_vm11, %v386_v15, %v808_v9 }
  0xcb   : > { %v288_v16 = vsub.s32 %v284_v0, %v287_v14  ;;  %v388_v18 = vadd.s32 %v387_v17, %v383_v59  ;;  %v311_v0 = vsel %vm226_vm14, %v310_v61, %v286_v12 }
  0xcc   : > { %v313_v3 = vsel %vm225_vm15, 0, %v311_v0 }
  0xcd   : > { %v290_v19 = vsub.s32 0, %v288_v16  ;;  %v389_v20 = vadd.s32 536870912, %v388_v18  ;;  %v317_v6 = vadd.s32 3, %v313_v3 }
  0xcf   : > { %v523_v21 = vmin.u32 %v290_v19, %v288_v16  ;;  %v390_v22 = vshrl.u32 %v389_v20, 30  ;;  %v318_v9 = vand.u32 3, %v317_v6 }
  0xd1   : > { %v292_v23 = vclz %v523_v21  ;;  %v391_v24 = vshll.u32 %v390_v22, 30  ;;  %v414_v5 = vsub.s32 4, %v390_v22  ;;  %vm323_vm2 = vcmp.eq.s32.totalorder %v318_v9, 2 }
  0xd2   : > { %vm320_vm3 = vcmp.eq.s32.totalorder %v318_v9, 0  ;;  %vm319_vm4 = vcmp.lt.s32.totalorder %v318_v9, 2 }
  0xd3   : > { %v524_v25 = vadd.s32 4294967294, %v292_v23  ;;  %v392_v26 = vsub.s32 %v388_v18, %v391_v24  ;;  %v415_v8 = vsel %vm330_vm0, %v414_v5, %v390_v22 }
  0xd4   : > { %v417_v11 = vsel %vm329_vm1, 0, %v415_v8 }
  0xd5   : > { %vm525_vm12 = vcmp.lt.s32.totalorder %v524_v25, 0  ;;  %v394_v28 = vsub.s32 0, %v392_v26  ;;  %v421_v15 = vadd.s32 3, %v417_v11 }
  0xd6   : > { %v295_v27 = vsel %vm525_vm12, 0, %v524_v25 }
  0xd7   : > { %v296_v30 = vsub.s32 32, %v295_v27  ;;  %v300_v31 = vsub.s32 4294967266, %v295_v27  ;;  %v527_v32 = vmin.u32 %v394_v28, %v392_v26  ;;  %v297_v33 = vshll.u32 %v288_v16, %v295_v27 }
  0xd8   : > { %v422_v18 = vand.u32 3, %v421_v15 }
  0xd9   : > { %v298_v34 = vshrl.u32 %v280_v29, %v296_v30  ;;  %v301_v40 = vadd.s32 127, %v300_v31  ;;  %v396_v41 = vclz %v527_v32 }
  0xda   : > { %vm427_vm6 = vcmp.eq.s32.totalorder %v422_v18, 2  ;;  %vm424_vm7 = vcmp.eq.s32.totalorder %v422_v18, 0  ;;  %vm423_vm8 = vcmp.lt.s32.totalorder %v422_v18, 2 }
  0xdb   : > { %v299_v43 = vor.u32 %v298_v34, %v297_v33  ;;  %v302_v44 = vshll.u32 %v301_v40, 23  ;;  %v528_v45 = vadd.s32 4294967294, %v396_v41 }
  0xdd   : > { %v303_v46 = vor.u32 4788187, %v302_v44  ;;  %vm529_vm13 = vcmp.lt.s32.totalorder %v528_v45, 0  ;;  %v306_v48 = vcvt.s32.f32 %v299_v43 }
  0xde   : > { %v399_v49 = vsel %vm529_vm13, 0, %v528_v45 }
  0xdf   : > { %v304_v47 = vand.u32 2147483647, %v303_v46  ;;  %v400_v51 = vsub.s32 32, %v399_v49  ;;  %v404_v52 = vsub.s32 4294967266, %v399_v49  ;;  %v401_v39 = vshll.u32 %v392_v26, %v399_v49 }
  0xe1   : > { %v307_v38 = vmul.f32 %v306_v48, %v304_v47  ;;  %v402_v53 = vshrl.u32 %v384_v50, %v400_v51  ;;  %v405_v56 = vadd.s32 127, %v404_v52 }
  0xe3   : > { %v308_v58 = vxor.u32 2147483648, %v307_v38  ;;  %v403_v62 = vor.u32 %v402_v53, %v401_v39  ;;  %v406_v55 = vshll.u32 %v405_v56, 23 }
  0xe5   : > { %v309_v63 = vsel %vm226_vm14, %v308_v58, %v307_v38  ;;  %v407_v57 = vor.u32 4788187, %v406_v55  ;;  %v410_v1 = vcvt.s32.f32 %v403_v62 }
  0xe6   : > { %v312_v54 = vsel %vm225_vm15, %v766_v35, %v309_v63 }
  0xe7   : > { %601 = vcosq.f32 %v312_v54  ;;  %v408_v60 = vand.u32 2147483647, %v407_v57 }
  0xe8   : > { %603 = vsinq.f32 %v312_v54 }
  0xe9   : > { %v411_v2 = vmul.f32 %v410_v1, %v408_v60 }
  0xeb   : > { %v412_v4 = vxor.u32 2147483648, %v411_v2 }
  0xed   : > { %v413_v37 = vsel %vm330_vm0, %v412_v4, %v411_v2 }
  0xee   : > { %v416_v7 = vsel %vm329_vm1, %v768_v36, %v413_v37 }
  0xef   : > { %605 = vcosq.f32 %v416_v7 }
  0xf0   : > { %607 = vsinq.f32 %v416_v7 }
  0xf4   : > { %v602_v10 = vpop.eup %601 }
  0xf5   : > { %v604_v12 = vpop.eup %603  ;;  %v324_v13 = vxor.u32 2147483648, %v602_v10 }
  0xf6   : > { %v321_v14 = vxor.u32 2147483648, %v604_v12 }
  0xf7   : > { %v325_v42 = vsel %vm323_vm2, %v324_v13, %v604_v12 }
  0xf8   : > { %v322_v59 = vsel %vm320_vm3, %v602_v10, %v321_v14 }
  0xf9   : > { %v326_v16 = vsel %vm319_vm4, %v322_v59, %v325_v42 }
  0xfa   : > { %v327_v17 = vsel %vm316_vm5, nan, %v326_v16 }
  0xfb   : > { %432 = vst [vmem:[%s137_s16] sm:$0xff] %v327_v17 }
  0xfc   : > { %v606_v19 = vpop.eup %605 }
  0xfd   : > { %v608_v20 = vpop.eup %607  ;;  %v428_v21 = vxor.u32 2147483648, %v606_v19 }
  0xfe   : > { %v425_v22 = vxor.u32 2147483648, %v608_v20 }
  0xff   : > { %v429_v23 = vsel %vm427_vm6, %v428_v21, %v608_v20 }
 0x100   : > { %v426_v24 = vsel %vm424_vm7, %v606_v19, %v425_v22 }
 0x101   : > { %v430_v35 = vsel %vm423_vm8, %v426_v24, %v429_v23 }
 0x102   : > { %v431_v25 = vsel %vm420_vm9, nan, %v430_v35 }
 0x103   : > { %433 = vst [vmem:[%s137_s16 + $0x8] sm:$0xff] %v431_v25 }
 0x104   : > { %622 = shalt.err (!%p619_p3)
}
 0x105   : > { %s623_s29 = scalar_lea.hbm %s834_s24, 256  ;;  %s627_s4 = scalar_lea.hbm %s883_s2, 512 }
 0x106   : > { %p624_p4 = scmp.ne.s32.totalorder %s834_s24, %s623_s29  ;;  %p628_p9 = scmp.lt.s32.totalorder %s834_s24, %s883_s2 }
 0x107   : > { %p629_p10 = scmp.lt.s32.totalorder %s627_s4, %s623_s29 }
 0x108   : > { %p625_p7 = pnand %p624_p4, %p737_p5 }
 0x109   : > { %p630_p11 = por %p629_p10, %p628_p9 }
 0x10a   : > { %p626_p8 = pneg %p625_p7 }
 0x10c   : > { %p631_p12 = pnand %p630_p11, %p626_p8 }
 0x10e   : > { %634 = shalt.err (!%p631_p12)
}
 0x10f   : > { %s682_s7 = smov 128   ;;  %s683_s8 = smov 8  }
 0x110   : > { %544 = dma.vmem_to_hbm [thread:$0]  (%p737_p5), %s836_s21, 256, %s834_s24, %s841_s13, %s682_s7, %s682_s7, %s683_s8  }
 0x111 PF: > { %p550_p13 = scmp.ge.s32.totalorder %s669_s12, 2  ;;  %s463_s14 = sand.u32 1, %s657_s9  }
 0x112   : > { %s464_s16 = scalar_lea.sflag [#allocation3], %s463_s14 }
 0x113   : > { %p547_p0 = pnand %p550_p13, %p741_p6 }
 0x115   : > { %p548_p1 = pneg %p547_p0 }
 0x117   : > { %652 = dma.done.wait (%p548_p1), %s464_s16, 256  }
 0x118   : > { %654 = vsyncadd (%p548_p1), %s464_s16, 4294967040  ;;  %p12_p2 = scmp.ge.s32.totalorder %s724_s15, 4   ;;  %s886_s9 = smov %s661_s10 }
 0x119   : > { %s887_s10 = smov %s665_s11  ;;  %s888_s11 = smov %s735_s18 }
 0x11a   : > { %s889_s12 = smov %s724_s15  ;;  %14 = sbr.rel (!%p12_p2) target bundleno = 3 (0x3), region = 63 }
 0x11f   :  { %469 = vsyncpa [#allocation3], 1 }
 0x120   :  { %471 = vsyncpa [#allocation3 + $0x1], 1 }

</bundles_post_ra>
